<compile_context>
chip_gen: v5e
topology: v5e:2x2
jax: 0.10.0
libtpu: 0.0.40
codegen_flags: <defaults>
</compile_context>

<pallas_src>
import jax
import jax.numpy as jnp
from jax.experimental import pallas as pl
from jax.experimental.pallas import tpu as pltpu

_LANE = 128
_SUBLANE = 8
_DEFAULT_FAST_PATH_VMEM = 8 * 1024 * 1024   # double-buffered per-member budget


def _round_up(x, m):
    return ((x + m - 1) // m) * m


def _largest_divisor_tile(padded, gran, cap):
    """Largest multiple of `gran` that divides `padded` and is <= cap."""
    best = gran
    cand = gran
    limit = min(padded, cap)
    while cand <= limit:
        if padded % cand == 0:
            best = cand
        cand += gran
    return best


# ---------------------------------------------------------------------------
# Kernels
# ---------------------------------------------------------------------------
def _fused_kernel(x_ref, w_ref, b_ref, o_ref):
    """Whole per-member problem in one block: out = x @ w + b."""
    acc = jnp.dot(x_ref[0], w_ref[0], preferred_element_type=jnp.float32)
    o_ref[0] = (acc + b_ref[0].astype(jnp.float32)).astype(o_ref.dtype)


def _tiled_kernel_f32out(x_ref, w_ref, b_ref, o_ref):
    """K-tiled matmul accumulating directly into the resident f32 output block."""
    k = pl.program_id(3)
    partial = jnp.dot(x_ref[0], w_ref[0], preferred_element_type=jnp.float32)

    @pl.when(k == 0)
    def _():
        o_ref[0] = partial + b_ref[0].astype(jnp.float32)

    @pl.when(k != 0)
    def _():
        o_ref[0] = o_ref[0] + partial


def _tiled_kernel_acc(x_ref, w_ref, b_ref, o_ref, acc_ref):
    """K-tiled matmul with an f32 scratch accumulator (non-f32 outputs)."""
    k = pl.program_id(3)

    @pl.when(k == 0)
    def _():
        acc_ref[...] = jnp.zeros_like(acc_ref)

    acc_ref[...] += jnp.dot(x_ref[0], w_ref[0],
                            preferred_element_type=jnp.float32)

    @pl.when(k == pl.num_programs(3) - 1)
    def _():
        o_ref[0] = (acc_ref[...] + b_ref[0].astype(jnp.float32)
                    ).astype(o_ref.dtype)


# ---------------------------------------------------------------------------
# Wrapper
# ---------------------------------------------------------------------------
def ensemble_linear(x, weight, bias, compute_dtype=None,
                    fast_path_vmem_bytes=_DEFAULT_FAST_PATH_VMEM):
    """Pallas implementation of EnsembleLinear.forward.

    x: (N, in) or (E, N, in); weight: (E, in, out); bias: (E, 1, out).
    Returns (E, N, out) in x.dtype.

    compute_dtype: optional narrow dtype (e.g. jnp.bfloat16) for x/weight;
      accumulation and the bias add stay f32.
    """
    E, K, OUT = weight.shape
    shared = (x.ndim == 2)
    if shared:
        N = x.shape[0]
        assert x.shape[1] == K
        x3 = x.reshape(1, N, K)
    else:
        assert x.shape[0] == E and x.shape[2] == K
        N = x.shape[1]
        x3 = x
    out_dtype = x.dtype

    # Pad to hardware granularity only (sublane=8 for M, lane=128 for K/OUT).
    Mp = _round_up(N, _SUBLANE)
    Kp = _round_up(K, _LANE)
    OUTp = _round_up(OUT, _LANE)

    if (Mp, Kp) != (N, K):
        x3 = jnp.pad(x3, ((0, 0), (0, Mp - N), (0, Kp - K)))
    # TODO(synk): when K/OUT are not 128-aligned, callers should pre-pad and
    # cache weight/bias (they are parameters) instead of paying this per call.
    if (Kp, OUTp) != (K, OUT):
        weight = jnp.pad(weight, ((0, 0), (0, Kp - K), (0, OUTp - OUT)))
    if OUTp != OUT:
        bias = jnp.pad(bias, ((0, 0), (0, 0), (0, OUTp - OUT)))

    if compute_dtype is not None:
        x3 = x3.astype(compute_dtype)
        weight = weight.astype(compute_dtype)

    in_bytes = x3.dtype.itemsize
    out_bytes = jnp.dtype(out_dtype).itemsize
    per_member = (Mp * Kp * in_bytes + Kp * OUTp * in_bytes
                  + OUTp * bias.dtype.itemsize + Mp * OUTp * out_bytes)
    use_fast = 2 * per_member <= fast_path_vmem_bytes

    if use_fast:
        # Single-block fast path: grid over E only, no K loop, no scratch.
        x_idx = (lambda e: (0, 0, 0)) if shared else (lambda e: (e, 0, 0))
        out = pl.pallas_call(
            _fused_kernel,
            out_shape=jax.ShapeDtypeStruct((E, Mp, OUTp), out_dtype),
            grid_spec=pltpu.PrefetchScalarGridSpec(
                num_scalar_prefetch=0,
                grid=(E,),
                in_specs=[
                    pl.BlockSpec((1, Mp, Kp), x_idx),
                    pl.BlockSpec((1, Kp, OUTp), lambda e: (e, 0, 0)),
                    pl.BlockSpec((1, 1, OUTp), lambda e: (e, 0, 0)),
                ],
                out_specs=pl.BlockSpec((1, Mp, OUTp), lambda e: (e, 0, 0)),
            ),
            compiler_params=pltpu.CompilerParams(
                dimension_semantics=("parallel",)),
        )(x3, weight, bias)
    else:
        # Tiled path: tiles are divisors of the padded dims (no extra padding).
        tm = _largest_divisor_tile(Mp, _SUBLANE, 512)
        tk = _largest_divisor_tile(Kp, _LANE, 1024)
        tn = _largest_divisor_tile(OUTp, _LANE, 512)
        x_idx = ((lambda e, i, j, k: (0, i, k)) if shared
                 else (lambda e, i, j, k: (e, i, k)))
        if out_dtype == jnp.float32:
            kernel, scratch = _tiled_kernel_f32out, []
        else:
            kernel = _tiled_kernel_acc
            scratch = [pltpu.VMEM((tm, tn), jnp.float32)]
        out = pl.pallas_call(
            kernel,
            out_shape=jax.ShapeDtypeStruct((E, Mp, OUTp), out_dtype),
            grid_spec=pltpu.PrefetchScalarGridSpec(
                num_scalar_prefetch=0,
                grid=(E, Mp // tm, OUTp // tn, Kp // tk),
                in_specs=[
                    pl.BlockSpec((1, tm, tk), x_idx),
                    pl.BlockSpec((1, tk, tn), lambda e, i, j, k: (e, k, j)),
                    # bias index constant across i and k -> stays VMEM-resident
                    pl.BlockSpec((1, 1, tn), lambda e, i, j, k: (e, 0, j)),
                ],
                out_specs=pl.BlockSpec((1, tm, tn),
                                       lambda e, i, j, k: (e, i, j)),
                scratch_shapes=scratch,
            ),
            compiler_params=pltpu.CompilerParams(
                dimension_semantics=("parallel", "parallel", "parallel",
                                     "arbitrary"),
                vmem_limit_bytes=32 * 1024 * 1024),
        )(x3, weight, bias)

    if Mp != N or OUTp != OUT:
        out = out[:, :N, :OUT]
    return out


def init_ensemble_linear_params(key, in_features, out_features, ensemble_size,
                                dtype=jnp.float32):
    """Deterministic init matching the PyTorch module's __init__ semantics."""
    scale_factor = 2.0 * (in_features ** 0.5)
    std = 1.0 / scale_factor
    w = jax.random.truncated_normal(
        key, -2.0, 2.0, (ensemble_size, in_features, out_features), dtype) * std
    b = jnp.zeros((ensemble_size, 1, out_features), dtype)
    return w, b


if __name__ == "__main__":
    key = jax.random.PRNGKey(0)
    ks = jax.random.split(key, 8)

    fwd = jax.jit(ensemble_linear,
                  static_argnames=("compute_dtype", "fast_path_vmem_bytes"))

    # ---------------- small module-sized shapes (fast path) ----------------
    E, in_f, out_f, N = 4, 32, 32, 8
    weight, _ = init_ensemble_linear_params(ks[0], in_f, out_f, E)
    bias = 0.1 * jax.random.normal(ks[1], (E, 1, out_f), jnp.float32)

    x2 = jax.random.normal(ks[2], (N, in_f), jnp.float32)
    out2 = jax.block_until_ready(fwd(x2, weight, bias))
    ref2 = jnp.einsum('ij,bjk->bik', x2, weight) + bias
    assert out2.shape == (E, N, out_f)
    assert jnp.allclose(out2, ref2, atol=1e-5, rtol=1e-5)

    x3 = jax.random.normal(ks[3], (E, N, in_f), jnp.float32)
    out3 = jax.block_until_ready(fwd(x3, weight, bias))
    ref3 = jnp.einsum('bij,bjk->bik', x3, weight) + bias
    assert out3.shape == (E, N, out_f)
    assert jnp.allclose(out3, ref3, atol=1e-5, rtol=1e-5)

    # ---- moderate shapes: exercises M/K/OUT padding, the tiled path
    #      (forced via fast_path_vmem_bytes=0) and the bf16 option ----
    E2, in2, out2f, N2 = 3, 1280, 200, 20
    w_big = (1.0 / (2.0 * in2 ** 0.5)) * jax.random.normal(
        ks[4], (E2, in2, out2f), jnp.float32)
    b_big = 0.1 * jax.random.normal(ks[5], (E2, 1, out2f), jnp.float32)

    y2 = jax.random.normal(ks[6], (N2, in2), jnp.float32)
    r2 = jnp.einsum('ij,bjk->bik', y2, w_big) + b_big
    o2_fast = jax.block_until_ready(fwd(y2, w_big, b_big))
    assert o2_fast.shape == (E2, N2, out2f)
    assert jnp.allclose(o2_fast, r2, atol=5e-4, rtol=5e-4)
    o2_tiled = jax.block_until_ready(
        fwd(y2, w_big, b_big, fast_path_vmem_bytes=0))
    assert jnp.allclose(o2_tiled, r2, atol=5e-4, rtol=5e-4)

    y3 = jax.random.normal(ks[7], (E2, N2, in2), jnp.float32)
    r3 = jnp.einsum('bij,bjk->bik', y3, w_big) + b_big
    o3_tiled = jax.block_until_ready(
        fwd(y3, w_big, b_big, fast_path_vmem_bytes=0))
    assert o3_tiled.shape == (E2, N2, out2f)
    assert jnp.allclose(o3_tiled, r3, atol=5e-4, rtol=5e-4)

    # bf16 inputs / f32 accumulation (looser tolerance vs. the f32 reference).
    o2_bf16 = jax.block_until_ready(
        fwd(y2, w_big, b_big, compute_dtype=jnp.bfloat16))
    assert o2_bf16.dtype == jnp.float32
    assert jnp.allclose(o2_bf16, r2, atol=5e-2, rtol=5e-2)
    o3_bf16 = jax.block_until_ready(
        fwd(y3, w_big, b_big, compute_dtype=jnp.bfloat16,
            fast_path_vmem_bytes=0))
    assert jnp.allclose(o3_bf16, r3, atol=5e-2, rtol=5e-2)

    print("KERNEL_OK")
</pallas_src>

<mosaic_0001>
module attributes {stable_mosaic.version = 11 : i64} {
  func.func @_fused_kernel(%arg0: i32, %arg1: memref<1x8x128xf32, #tpu.memory_space<vmem>>, %arg2: memref<1x128x128xf32, #tpu.memory_space<vmem>>, %arg3: memref<1x1x128xf32, #tpu.memory_space<vmem>>, %arg4: memref<1x8x128xf32, #tpu.memory_space<vmem>>) attributes {dimension_semantics = [#tpu.dimension_semantics<parallel>], iteration_bounds = array<i64: 4>, scalar_prefetch = 0 : i64, scratch_operands = 0 : i64, tpu.core_type = #tpu.core_type<tc>, window_params = [{pipeline_mode = #tpu.pipeline_mode<synchronous>, transform_indices = @transform_0, window_bounds = array<i64: 1, 8, 128>}, {transform_indices = @transform_1, window_bounds = array<i64: 1, 128, 128>}, {transform_indices = @transform_2, window_bounds = array<i64: 1, 1, 128>}, {transform_indices = @transform_3, window_bounds = array<i64: 1, 8, 128>}]} {
    %c0 = arith.constant 0 : index
    %c0_0 = arith.constant 0 : index
    %c0_1 = arith.constant 0 : index
    %0 = vector.load %arg1[%c0, %c0_0, %c0_1] : memref<1x8x128xf32, #tpu.memory_space<vmem>>, vector<1x8x128xf32>
    %1 = vector.shape_cast %0 : vector<1x8x128xf32> to vector<8x128xf32>
    %c0_2 = arith.constant 0 : index
    %c0_3 = arith.constant 0 : index
    %c0_4 = arith.constant 0 : index
    %2 = vector.load %arg2[%c0_2, %c0_3, %c0_4] : memref<1x128x128xf32, #tpu.memory_space<vmem>>, vector<1x128x128xf32>
    %3 = vector.shape_cast %2 : vector<1x128x128xf32> to vector<128x128xf32>
    %cst = arith.constant dense<0.000000e+00> : vector<8x128xf32>
    %4 = tpu.matmul %1, %3, %cst {dimension_numbers = #tpu.dot_dimension_numbers<[1], [0], [0], [1], [0, 0, 1, 1], [], []>} : vector<8x128xf32>, vector<128x128xf32>, vector<8x128xf32> -> vector<8x128xf32>
    %c0_5 = arith.constant 0 : index
    %c0_6 = arith.constant 0 : index
    %c0_7 = arith.constant 0 : index
    %5 = vector.load %arg3[%c0_5, %c0_6, %c0_7] : memref<1x1x128xf32, #tpu.memory_space<vmem>>, vector<1x1x128xf32>
    %6 = vector.shape_cast %5 : vector<1x1x128xf32> to vector<1x128xf32>
    %7 = vector.broadcast %6 : vector<1x128xf32> to vector<8x128xf32>
    %8 = arith.addf %4, %7 : vector<8x128xf32>
    %c0_8 = arith.constant 0 : index
    %c0_9 = arith.constant 0 : index
    %c0_10 = arith.constant 0 : index
    %9 = vector.load %arg4[%c0_8, %c0_9, %c0_10] : memref<1x8x128xf32, #tpu.memory_space<vmem>>, vector<1x8x128xf32>
    %10 = vector.shape_cast %9 : vector<1x8x128xf32> to vector<8x128xf32>
    %11 = vector.shape_cast %8 : vector<8x128xf32> to vector<1x8x128xf32>
    tpu.vector_store %arg4[%c0_8, %c0_9, %c0_10], %11 {strides = array<i32>} : memref<1x8x128xf32, #tpu.memory_space<vmem>>, vector<1x8x128xf32>,
    return
  }
  func.func @transform_0(%arg0: i32) -> (i32, i32, i32) {
    %c0_i32 = arith.constant 0 : i32
    %c0_i32_0 = arith.constant 0 : i32
    %c0_i32_1 = arith.constant 0 : i32
    %c0_i32_2 = arith.constant 0 : i32
    return %c0_i32, %c0_i32_0, %c0_i32_1 : i32, i32, i32
  }
  func.func @transform_1(%arg0: i32) -> (i32, i32, i32) {
    %c0_i32 = arith.constant 0 : i32
    %c0_i32_0 = arith.constant 0 : i32
    %c0_i32_1 = arith.constant 0 : i32
    return %arg0, %c0_i32, %c0_i32_0 : i32, i32, i32
  }
  func.func @transform_2(%arg0: i32) -> (i32, i32, i32) {
    %c0_i32 = arith.constant 0 : i32
    %c0_i32_0 = arith.constant 0 : i32
    %c0_i32_1 = arith.constant 0 : i32
    return %arg0, %c0_i32, %c0_i32_0 : i32, i32, i32
  }
  func.func @transform_3(%arg0: i32) -> (i32, i32, i32) {
    %c0_i32 = arith.constant 0 : i32
    %c0_i32_0 = arith.constant 0 : i32
    %c0_i32_1 = arith.constant 0 : i32
    return %arg0, %c0_i32, %c0_i32_0 : i32, i32, i32
  }
}

</mosaic_0001>

<bundles_post_ra>
// kernel: ensemble_linear.1
= control target key start
LH: loop header
LB: loop body
LE: loop exit
PB: predicated region body
PF: predicated region fallthrough
CT: control target
= control target key end

     0   :  { %8 = vsyncpa [#allocation3], 0  ;;  %s545_s0 = inlined_call_operand.vmem [shape: f32[1,8,128], index: 0, kind: input, shape index: {}]   ;;  %s546_s1 = inlined_call_operand.vmem [shape: f32[4,128,128], index: 1, kind: input, shape index: {}]   ;;  %s547_s2 = inlined_call_operand.vmem [shape: f32[4,1,128], index: 2, kind: input, shape index: {}]   ;;  %s548_s3 = inlined_call_operand.hbm [shape: f32[4,8,128], index: 3, kind: output, shape index: {}]  }
   0x1   :  { %10 = vsyncpa [#allocation3 + $0x1], 0  ;;  %s445_s12 = smov 0   ;;  %s447_s13 = smov 0  }
   0x2   :  { %s449_s14 = smov 0   ;;  %s451_s15 = smov 0  }
   0x3 LB: > { %s466_s16 = sadd.s32 4294967295, %s423_s15   ;;  %s309_s17 = sadd.s32 4294967294, %s423_s15   ;;  %s423_s15 = sphi %s451_s15, %s554_s15   ;;  %s419_s14 = sphi %s449_s14, %s553_s14   ;;  %s415_s13 = sphi %s447_s13, %s552_s13   ;;  %s411_s12 = sphi %s445_s12, %s551_s12  }
   0x4   : > { %s470_s18 = sadd.s32 1, %s423_s15   ;;  %s96_s19 = sadd.s32 1, %s419_s14 }
   0x5   : > { %s93_s20 = ssub.s32 %s423_s15, %s470_s18  ;;  %p106_p0 = scmp.ne.s32.totalorder %s419_s14, %s415_s13 }
   0x6   : > { %p94_p1 = scmp.eq.s32.totalorder %s93_s20, 0  ;;  %p107_p2 = scmp.eq.s32.totalorder %s466_s16, 3 }
   0x7   : > { %p112_p3 = scmp.ne.s32.totalorder %s415_s13, %s411_s12  ;;  %p113_p4 = scmp.eq.s32.totalorder %s309_s17, 3 }
   0x8   : > { %s481_s21 = scalar_select %p94_p1, %s419_s14, %s96_s19  }
   0x9   : > { %p483_p5 = por %p107_p2, %p106_p0  ;;  %p487_p6 = por %p113_p4, %p112_p3 }
   0xa   : > { %p312_p7 = scmp.ge.s32.totalorder %s423_s15, 1  ;;  %p148_p8 = scmp.lt.s32.totalorder %s423_s15, 5 }
   0xc   : > { %p149_p9 = pnand %p312_p7, %p148_p8 }
   0xd   : > { %p175_p10 = scmp.lt.s32.totalorder (!%p149_p9), %s466_s16, 3  ;;  %s172_s7 = sand.u32 (!%p149_p9), 1, %s415_s13  }
   0xe   : > { %152 = sbr.rel (%p149_p9) target bundleno = 186 (0xba), region = 32  ;;  %s313_s8 = sshll.u32 (!%p149_p9), %s172_s7, 3 }
   0xf   : > { %s317_s9 = sshll.u32 (!%p149_p9), %s466_s16, 3  ;;  %s226_s29 = scalar_lea.sflag (!%p149_p9), [#allocation3], %s172_s7 }
  0x10   : > { %s236_s17 = scalar_lea.hbm (!%p149_p9), %s548_s3, %s317_s9 }
  0x11   : > { %s240_s27 = sshll.u32 (!%p149_p9), %s236_s17, 4  ;;  %s241_s27 = int_to_ptr.hbm [resolvable:$true] %s240_s27 }
  0x13   : > { %s495_s24 = scalar_select %p175_p10, %s466_s16, 3  ;;  %v183_v16 = vld [vmem:[%s545_s0] sm:$0xff] }
  0x14   : > { %s375_s16 = sshra.s32 %s241_s27, 4  ;;  %s376_s16 = int_to_ptr.hbm [resolvable:$true] %s375_s16 }
  0x15   : > { %s320_s25 = sshll.u32 %s495_s24, 7  ;;  %s182_s28 = scalar_lea.vmem %s547_s2, %s495_s24 }
  0x16   : > { %s179_s4 = scalar_lea.vmem %s546_s1, %s320_s25  ;;  %v360_v17 = vld [vmem:[%s182_s28] ss:$0 sm:$0xff]  ;;  %s174_s25 = scalar_lea.vmem [#allocation2], %s313_s8 }
  0x17   : > { %v199_v0 = vld [vmem:[%s179_s4 + $0x78] sm:$0xff]  ;;  %v198_v1 = vld [vmem:[%s179_s4 + $0x70] sm:$0xff]  ;;  %v197_v2 = vld [vmem:[%s179_s4 + $0x68] sm:$0xff]  ;;  %s238_s26 = sshll.u32 %s174_s25, 4  ;;  %s377_s30 = scalar_lea.hbm %s376_s16, 8  ;;  %s239_s26 = int_to_ptr.vmem [resolvable:$true] %s238_s26 }
  0x18   : > { %204 = vmatpush.msra.mxu0 %v199_v0  ;;  %v196_v3 = vld [vmem:[%s179_s4 + $0x60] sm:$0xff]  ;;  %v195_v4 = vld [vmem:[%s179_s4 + $0x58] sm:$0xff]  ;;  %v194_v5 = vld [vmem:[%s179_s4 + $0x50] sm:$0xff]  ;;  %p378_p11 = scmp.ne.s32.totalorder %s376_s16, %s377_s30  ;;  %s381_s24 = scalar_lea.hbm %s548_s3, 32 }
  0x19   : > { %v193_v6 = vld [vmem:[%s179_s4 + $0x48] sm:$0xff]  ;;  %v192_v7 = vld [vmem:[%s179_s4 + $0x40] sm:$0xff]  ;;  %v191_v8 = vld [vmem:[%s179_s4 + $0x38] sm:$0xff]  ;;  %p382_p0 = scmp.lt.s32.totalorder %s376_s16, %s548_s3  ;;  %p383_p1 = scmp.lt.s32.totalorder %s381_s24, %s377_s30 }
  0x1a   : > { %205 = vmatpush.msra.mxu0 %v198_v1  ;;  %v190_v9 = vld [vmem:[%s179_s4 + $0x30] sm:$0xff]  ;;  %v189_v10 = vld [vmem:[%s179_s4 + $0x28] sm:$0xff]  ;;  %v188_v11 = vld [vmem:[%s179_s4 + $0x20] sm:$0xff]  ;;  %p379_p12 = pnand %p378_p11, %p483_p5 }
  0x1b   : > { %v187_v12 = vld [vmem:[%s179_s4 + $0x18] sm:$0xff]  ;;  %v186_v13 = vld [vmem:[%s179_s4 + $0x10] sm:$0xff]  ;;  %v185_v14 = vld [vmem:[%s179_s4 + $0x8] sm:$0xff]  ;;  %p384_p2 = por %p383_p1, %p382_p0 }
  0x1c   : > { %206 = vmatpush.msra.mxu0 %v197_v2  ;;  %v184_v15 = vld [vmem:[%s179_s4] sm:$0xff]  ;;  %p380_p13 = pneg %p379_p12 }
  0x1e   : > { %207 = vmatpush.msra.mxu0 %v196_v3  ;;  %p385_p3 = pnand %p384_p2, %p380_p13 }
  0x20   : > { %208 = vmatpush.msra.mxu0 %v195_v4 }
  0x22   : > { %209 = vmatpush.msra.mxu0 %v194_v5 }
  0x24   : > { %210 = vmatpush.msra.mxu0 %v193_v6 }
  0x26   : > { %211 = vmatpush.msra.mxu0 %v192_v7 }
  0x28   : > { %212 = vmatpush.msra.mxu0 %v191_v8 }
  0x2a   : > { %213 = vmatpush.msra.mxu0 %v190_v9 }
  0x2c   : > { %214 = vmatpush.msra.mxu0 %v189_v10 }
  0x2e   : > { %215 = vmatpush.msra.mxu0 %v188_v11 }
  0x30   : > { %216 = vmatpush.msra.mxu0 %v187_v12 }
  0x32   : > { %217 = vmatpush.msra.mxu0 %v186_v13 }
  0x34   : > { %218 = vmatpush.msra.mxu0 %v185_v14 }
  0x36   : > { %219 = vmatpush.msra.mxu0 %v184_v15 }
  0x37   : > { %220 = vmatmul.f32.vlgmr.msra.gmra.mxu0 %v183_v16 }
  0xb4   : > { %v221_v18 = vpop.f32.mrf.mxu0 }
  0xb5   : > { %v222_v19 = vadd.f32 %v360_v17, %v221_v18 }
  0xb7   : > { %224 = vst [vmem:[%s174_s25] sm:$0xff] %v222_v19 }
  0xb8   : > { %388 = shalt.err (!%p385_p3)
}
  0xb9   : > { %321 = dma.vmem_to_hbm [thread:$0]  (%p483_p5), %s239_s26, 128, %s241_s27, %s226_s29  }
  0xba PF: > { %p327_p4 = scmp.ge.s32.totalorder %s423_s15, 2  ;;  %s252_s7 = sand.u32 1, %s411_s12  }
  0xbb   : > { %s253_s8 = scalar_lea.sflag [#allocation3], %s252_s7 }
  0xbc   : > { %p324_p7 = pnand %p327_p4, %p487_p6 }
  0xbe   : > { %p325_p8 = pneg %p324_p7 }
  0xc0   : > { %406 = dma.done.wait (%p325_p8), %s253_s8, 128  }
  0xc1   : > { %408 = vsyncadd (%p325_p8), %s253_s8, 4294967168  ;;  %p13_p9 = scmp.ge.s32.totalorder %s470_s18, 6   ;;  %s551_s12 = smov %s415_s13 }
  0xc2   : > { %s552_s13 = smov %s419_s14  ;;  %s553_s14 = smov %s481_s21 }
  0xc3   : > { %s554_s15 = smov %s470_s18  ;;  %15 = sbr.rel (!%p13_p9) target bundleno = 3 (0x3), region = 70 }
  0xc8   :  { %259 = vsyncpa [#allocation3], 1 }
  0xc9   :  { %261 = vsyncpa [#allocation3 + $0x1], 1 }

</bundles_post_ra>
